<compile_context>
chip_gen: v7x
topology: tpu7x:2x2x1
jax: 0.10.0
libtpu: 0.0.40
codegen_flags: <defaults>
</compile_context>

<pallas_src>
import functools

import jax
import jax.numpy as jnp
from jax import lax
from jax.experimental import pallas as pl
from jax.experimental.pallas import tpu as pltpu

ALPHA = 0.25
GAMMA = 2.0

_LANES = 128


def _focal_kernel(pred_ref, target_ref, out_ref, *, alpha, gamma):
    # Compute in f32 regardless of I/O dtype (free for f32 input, cheap VPU cast for bf16 I/O).
    pred = pred_ref[...].astype(jnp.float32)
    target = target_ref[...]  # native dtype (f32 / bf16 / int8 / bool) — compared, never upcast

    # One stable log-sigmoid, rest via identities (cuts EUP transcendental count):
    #   log_sigmoid(-x) = log_sigmoid(x) - x
    #   sigmoid(x)      = exp(log_sigmoid(x))
    #   1 - sigmoid(x)  = exp(log_sigmoid(-x))
    log_sig = jax.nn.log_sigmoid(pred)
    log_sig_inv = log_sig - pred
    sig = jnp.exp(log_sig)
    one_minus_sig = jnp.exp(log_sig_inv)

    g = float(gamma)
    if g == 2.0:
        pow_g = lambda x: x * x                      # 1 VPU mul, no EUP pow
    elif g.is_integer() and g >= 0.0:
        pow_g = lambda x: lax.integer_pow(x, int(g))  # VPU mul chain
    else:
        pow_g = lambda x: jnp.power(x, g)             # non-integer gamma: falls back to EUP exp/log

    pos_term = alpha * pow_g(one_minus_sig) * log_sig
    neg_term = (1.0 - alpha) * pow_g(sig) * log_sig_inv

    zero = jnp.zeros_like(pred)
    loss = jnp.where(target == 1, pos_term, zero)
    loss = loss + jnp.where(target == 0, neg_term, zero)
    out_ref[...] = (-loss).astype(out_ref.dtype)


def focal_loss_with_logits(pred, target, alpha=ALPHA, gamma=GAMMA, *, block_rows=2048):
    """Elementwise focal loss with logits. pred/target: same shape; returns pred-shaped loss.

    `target` is read in its native dtype (pass bool/int8 to cut HBM traffic ~25%);
    the wrapper never upcasts it to pred.dtype.
    """
    assert pred.shape == target.shape, "pred/target shape mismatch"
    orig_shape = pred.shape
    total = pred.size

    rows = pl.cdiv(total, _LANES)
    # Tile sizing: up to `block_rows` rows.  2048 rows x 128 lanes x 4 B = 1 MiB per f32
    # input tile; 3 arrays x 2 pipeline buffers ~= 6 MiB, comfortably under the scoped
    # VMEM limit on v5e (16 MiB) and v6e/v7x (32 MiB).  Round rows up to a multiple of
    # 8 sublanes so the (tr, 128) block always satisfies the (8, 128) constraint.
    tr = min(int(block_rows), ((rows + 7) // 8) * 8)
    tr = max(tr, 8)
    grid_rows = pl.cdiv(rows, tr)
    rows_padded = grid_rows * tr
    padded_total = rows_padded * _LANES
    pad = padded_total - total

    pred_flat = pred.reshape(-1)
    target_flat = target.reshape(-1)
    if pad:
        pred_flat = jnp.pad(pred_flat, (0, pad))
        target_flat = jnp.pad(target_flat, (0, pad))

    pred2d = pred_flat.reshape(rows_padded, _LANES)
    target2d = target_flat.reshape(rows_padded, _LANES)

    kernel = functools.partial(_focal_kernel, alpha=float(alpha), gamma=float(gamma))

    out2d = pl.pallas_call(
        kernel,
        out_shape=jax.ShapeDtypeStruct((rows_padded, _LANES), pred.dtype),
        grid_spec=pltpu.PrefetchScalarGridSpec(
            num_scalar_prefetch=0,
            grid=(grid_rows,),
            in_specs=[
                pl.BlockSpec((tr, _LANES), lambda i: (i, 0)),
                pl.BlockSpec((tr, _LANES), lambda i: (i, 0)),
            ],
            out_specs=pl.BlockSpec((tr, _LANES), lambda i: (i, 0)),
        ),
        compiler_params=pltpu.CompilerParams(
            dimension_semantics=("parallel",),
        ),
    )(pred2d, target2d)

    out_flat = out2d.reshape(-1)
    if pad:
        out_flat = out_flat[:total]
    return out_flat.reshape(orig_shape)


def _reference(pred, target, alpha=ALPHA, gamma=GAMMA):
    # Direct transcription of the PyTorch module.
    sig = jax.nn.sigmoid(pred)
    log_sig = jax.nn.log_sigmoid(pred)
    log_sig_inv = jax.nn.log_sigmoid(-pred)
    loss = (target == 1) * alpha * jnp.power(1.0 - sig, gamma) * log_sig
    loss = loss + (target == 0) * (1.0 - alpha) * jnp.power(sig, gamma) * log_sig_inv
    return -loss


if __name__ == "__main__":
    key = jax.random.PRNGKey(0)
    k1, k2, k3, k4 = jax.random.split(key, 4)

    # NCHW inputs: per-pixel class heatmap logits and binary targets.
    shape = (2, 4, 16, 16)
    pred = jax.random.normal(k1, shape, dtype=jnp.float32) * 2.0
    target = (jax.random.uniform(k2, shape) > 0.7).astype(jnp.float32)

    out = focal_loss_with_logits(pred, target)
    out = jax.block_until_ready(out)
    ref = _reference(pred, target)
    assert out.shape == shape
    assert jnp.allclose(out, ref, atol=1e-5, rtol=1e-5), "mismatch vs reference"

    # Second case: size not divisible by 128 (exercises the padding path).
    shape2 = (3, 5, 7, 11)
    pred2 = jax.random.normal(k3, shape2, dtype=jnp.float32) * 2.0
    target2 = (jax.random.uniform(k4, shape2) > 0.7).astype(jnp.float32)
    out2 = jax.block_until_ready(focal_loss_with_logits(pred2, target2))
    ref2 = _reference(pred2, target2)
    assert out2.shape == shape2
    assert jnp.allclose(out2, ref2, atol=1e-5, rtol=1e-5), "mismatch vs reference (padded case)"

    print("KERNEL_OK")
</pallas_src>

<mosaic_0001>
module attributes {stable_mosaic.version = 11 : i64} {
  func.func @_focal_kernel(%arg0: i32, %arg1: memref<16x128xf32, #tpu.memory_space<vmem>>, %arg2: memref<16x128xf32, #tpu.memory_space<vmem>>, %arg3: memref<16x128xf32, #tpu.memory_space<vmem>>) attributes {dimension_semantics = [#tpu.dimension_semantics<parallel>], iteration_bounds = array<i64: 1>, scalar_prefetch = 0 : i64, scratch_operands = 0 : i64, tpu.core_type = #tpu.core_type<tc>, window_params = [{transform_indices = @transform_0, window_bounds = array<i64: 16, 128>}, {transform_indices = @transform_1, window_bounds = array<i64: 16, 128>}, {transform_indices = @transform_2, window_bounds = array<i64: 16, 128>}]} {
    %c0 = arith.constant 0 : index
    %c0_0 = arith.constant 0 : index
    %0 = vector.load %arg1[%c0, %c0_0] : memref<16x128xf32, #tpu.memory_space<vmem>>, vector<16x128xf32>
    %c0_1 = arith.constant 0 : index
    %c0_2 = arith.constant 0 : index
    %1 = vector.load %arg2[%c0_1, %c0_2] : memref<16x128xf32, #tpu.memory_space<vmem>>, vector<16x128xf32>
    %cst = arith.constant 0.000000e+00 : f32
    %2 = vector.broadcast %cst : f32 to vector<16x128xf32>
    %3 = arith.subf %2, %0 : vector<16x128xf32>
    %cst_3 = arith.constant 0.000000e+00 : f32
    %4 = vector.broadcast %cst_3 : f32 to vector<16x128xf32>
    %5 = arith.maximumf %3, %4 : vector<16x128xf32>
    %6 = vector.broadcast %cst_3 : f32 to vector<16x128xf32>
    %7 = arith.subf %3, %6 : vector<16x128xf32>
    %8 = arith.cmpf one, %7, %7 : vector<16x128xf32>
    %9 = vector.broadcast %cst_3 : f32 to vector<16x128xf32>
    %10 = arith.addf %3, %9 : vector<16x128xf32>
    %11 = math.absf %7 : vector<16x128xf32>
    %cst_4 = arith.constant 0.000000e+00 : f32
    %12 = vector.broadcast %cst_4 : f32 to vector<16x128xf32>
    %13 = arith.subf %12, %11 : vector<16x128xf32>
    %14 = math.exp %13 : vector<16x128xf32>
    %15 = math.log1p %14 : vector<16x128xf32>
    %16 = arith.addf %5, %15 : vector<16x128xf32>
    %17 = arith.select %8, %10, %16 : vector<16x128xi1>, vector<16x128xf32>
    %cst_5 = arith.constant 0.000000e+00 : f32
    %18 = vector.broadcast %cst_5 : f32 to vector<16x128xf32>
    %19 = arith.subf %18, %17 : vector<16x128xf32>
    %20 = arith.subf %19, %0 : vector<16x128xf32>
    %21 = math.exp %19 : vector<16x128xf32>
    %22 = math.exp %20 : vector<16x128xf32>
    %23 = arith.mulf %22, %22 : vector<16x128xf32>
    %cst_6 = arith.constant 2.500000e-01 : f32
    %24 = vector.broadcast %cst_6 : f32 to vector<16x128xf32>
    %25 = arith.mulf %24, %23 : vector<16x128xf32>
    %26 = arith.mulf %25, %19 : vector<16x128xf32>
    %27 = arith.mulf %21, %21 : vector<16x128xf32>
    %cst_7 = arith.constant 7.500000e-01 : f32
    %28 = vector.broadcast %cst_7 : f32 to vector<16x128xf32>
    %29 = arith.mulf %28, %27 : vector<16x128xf32>
    %30 = arith.mulf %29, %20 : vector<16x128xf32>
    %cst_8 = arith.constant 0.000000e+00 : f32
    %31 = vector.broadcast %cst_8 : f32 to vector<16x128xf32>
    %cst_9 = arith.constant 1.000000e+00 : f32
    %32 = vector.broadcast %cst_9 : f32 to vector<16x128xf32>
    %33 = arith.cmpf oeq, %1, %32 : vector<16x128xf32>
    %34 = arith.select %33, %26, %31 : vector<16x128xi1>, vector<16x128xf32>
    %cst_10 = arith.constant 0.000000e+00 : f32
    %35 = vector.broadcast %cst_10 : f32 to vector<16x128xf32>
    %36 = arith.cmpf oeq, %1, %35 : vector<16x128xf32>
    %37 = arith.select %36, %30, %31 : vector<16x128xi1>, vector<16x128xf32>
    %38 = arith.addf %34, %37 : vector<16x128xf32>
    %cst_11 = arith.constant 0.000000e+00 : f32
    %39 = vector.broadcast %cst_11 : f32 to vector<16x128xf32>
    %40 = arith.subf %39, %38 : vector<16x128xf32>
    %c0_12 = arith.constant 0 : index
    %c0_13 = arith.constant 0 : index
    %41 = vector.load %arg3[%c0_12, %c0_13] : memref<16x128xf32, #tpu.memory_space<vmem>>, vector<16x128xf32>
    tpu.vector_store %arg3[%c0_12, %c0_13], %40 {strides = array<i32>} : memref<16x128xf32, #tpu.memory_space<vmem>>, vector<16x128xf32>,
    return
  }
  func.func @transform_0(%arg0: i32) -> (i32, i32) {
    %c0_i32 = arith.constant 0 : i32
    %c0_i32_0 = arith.constant 0 : i32
    return %arg0, %c0_i32 : i32, i32
  }
  func.func @transform_1(%arg0: i32) -> (i32, i32) {
    %c0_i32 = arith.constant 0 : i32
    %c0_i32_0 = arith.constant 0 : i32
    return %arg0, %c0_i32 : i32, i32
  }
  func.func @transform_2(%arg0: i32) -> (i32, i32) {
    %c0_i32 = arith.constant 0 : i32
    %c0_i32_0 = arith.constant 0 : i32
    return %arg0, %c0_i32 : i32, i32
  }
}

</mosaic_0001>

<bundles_post_ra>
// kernel: tpu_custom_call.1
= control target key start
LH: loop header
LB: loop body
LE: loop exit
PB: predicated region body
PF: predicated region fallthrough
CT: control target
= control target key end

     0   :  { %7 = vsyncpa [#allocation3], 0  ;;  %s296_s0 = inlined_call_operand.hbm [shape: f32[16,128], index: 0, kind: input, shape index: {}]   ;;  %s297_s1 = inlined_call_operand.hbm [shape: f32[16,128], index: 1, kind: input, shape index: {}]   ;;  %s298_s2 = inlined_call_operand.hbm [shape: f32[16,128], index: 2, kind: output, shape index: {}]  }
   0x1   :  { %8 = vsyncpa [#allocation6], 0 }
   0x2   :  { %9 = vsyncpa [#allocation4], 0  ;;  %s231_s9 = smov [#allocation2]   ;;  %s159_s13 = scalar_lea.hbm %s296_s0, 256 }
   0x3   :  { %s15_s10 = sshll.u32 %s231_s9, 4  ;;  %p160_p0 = scmp.ne.s32.totalorder %s296_s0, %s159_s13  ;;  %s16_s10 = int_to_ptr.vmem [resolvable:$true] %s15_s10 }
   0x4   :  { %p163_p1 = scmp.lt.u32.totalorder %s159_s13, %s296_s0 }
   0x6   :  { %p165_p2 = pnand %p163_p1, %p160_p0 }
   0x8   :  { %168 = shalt.err (!%p165_p2)
}
   0x9   :  { %s169_s18 = scalar_lea.vmem %s16_s10, 256  ;;  %p174_p4 = scmp.lt.s32.totalorder %s16_s10, %s16_s10 }
   0xa   :  { %p170_p3 = scmp.ne.s32.totalorder %s16_s10, %s169_s18  ;;  %p175_p5 = scmp.lt.s32.totalorder %s169_s18, %s169_s18 }
   0xc   :  { %p176_p6 = por %p175_p5, %p174_p4 }
   0xe   :  { %p177_p7 = pnand %p176_p6, %p170_p3 }
  0x10   :  { %180 = shalt.err (!%p177_p7)
}
  0x11   :  { %s232_s19 = smov 128   ;;  %s233_s20 = smov 8  }
  0x12   :  { %21 = dma.hbm_to_vmem [thread:$0]  %s296_s0, 256, %s16_s10, [#allocation3], %s232_s19, %s232_s19, %s233_s20  }
  0x13   :  { %s234_s23 = smov [#allocation5]   ;;  %s181_s27 = scalar_lea.hbm %s297_s1, 256 }
  0x14   :  { %s27_s24 = sshll.u32 %s234_s23, 4  ;;  %p182_p8 = scmp.ne.s32.totalorder %s297_s1, %s181_s27  ;;  %s28_s24 = int_to_ptr.vmem [resolvable:$true] %s27_s24 }
  0x15   :  { %p185_p9 = scmp.lt.u32.totalorder %s181_s27, %s297_s1 }
  0x17   :  { %p187_p10 = pnand %p185_p9, %p182_p8 }
  0x19   :  { %190 = shalt.err (!%p187_p10)
}
  0x1a   :  { %s191_s4 = scalar_lea.vmem %s28_s24, 256  ;;  %p196_p12 = scmp.lt.s32.totalorder %s28_s24, %s28_s24 }
  0x1b   :  { %p192_p11 = scmp.ne.s32.totalorder %s28_s24, %s191_s4  ;;  %p197_p13 = scmp.lt.s32.totalorder %s191_s4, %s191_s4 }
  0x1d   :  { %p198_p0 = por %p197_p13, %p196_p12 }
  0x1f   :  { %p199_p1 = pnand %p198_p0, %p192_p11 }
  0x21   :  { %202 = shalt.err (!%p199_p1)
}
  0x22   :  { %33 = dma.hbm_to_vmem [thread:$0]  %s297_s1, 256, %s28_s24, [#allocation6], %s232_s19, %s232_s19, %s233_s20  }
  0x23   :  { %225 = dma.done.wait [#allocation3], 256  }
  0x24   :  { %226 = vsyncadd [#allocation3], 4294967040 }
  0x25   :  { %227 = dma.done.wait [#allocation6], 256  }
  0x26   :  { %228 = vsyncadd [#allocation6], 4294967040  ;;  %v40_v0 = vld [vmem:[#allocation2] sm:$0xff]  ;;  %v41_v1 = vld [vmem:[#allocation2 + $0x8] sm:$0xff]  ;;  %s235_s1 = smov [#allocation7]  }
  0x27   :  { %v44_v2 = vsub.f32 0.0, %v40_v0  ;;  %v45_v3 = vsub.f32 0.0, %v41_v1  ;;  %v42_v44 = vld [vmem:[#allocation5] sm:$0xff]  ;;  %v43_v47 = vld [vmem:[#allocation5 + $0x8] sm:$0xff]  ;;  %s125_s6 = sshll.u32 %s235_s1, 4  ;;  %s126_s6 = int_to_ptr.vmem [resolvable:$true] %s125_s6 }
  0x28   :  { %vm110_vm4 = vcmp.eq.f32.partialorder %v42_v44, 0.0  ;;  %vm111_vm5 = vcmp.eq.f32.partialorder %v43_v47, 0.0  ;;  %vm106_vm6 = vcmp.eq.f32.partialorder %v42_v44, 1.0  ;;  %vm107_vm7 = vcmp.eq.f32.partialorder %v43_v47, 1.0  ;;  %s203_s7 = scalar_lea.vmem %s126_s6, 256  ;;  %p208_p3 = scmp.lt.s32.totalorder %s126_s6, %s126_s6 }
  0x29   :  { %v52_v4 = vand.u32 2147483647, %v44_v2  ;;  %v53_v5 = vand.u32 2147483647, %v45_v3  ;;  %v46_v22 = vmax.f32 %v44_v2, 0.0  ;;  %v47_v26 = vmax.f32 %v45_v3, 0.0  ;;  %p204_p2 = scmp.ne.s32.totalorder %s126_s6, %s203_s7  ;;  %p209_p4 = scmp.lt.s32.totalorder %s203_s7, %s203_s7 }
  0x2a   :  { %vm48_vm2 = vcmp.ne.f32.partialorder %v44_v2, %v44_v2  ;;  %vm49_vm3 = vcmp.ne.f32.partialorder %v45_v3, %v45_v3 }
  0x2b   :  { %v54_v6 = vsub.f32 0.0, %v52_v4  ;;  %v55_v7 = vsub.f32 0.0, %v53_v5  ;;  %p210_p5 = por %p209_p4, %p208_p3 }
  0x2d   :  { %v56_v8 = vmul.f32 1.442695, %v54_v6  ;;  %v58_v9 = vmul.f32 1.442695, %v55_v7  ;;  %p211_p6 = pnand %p210_p5, %p204_p2 }
  0x2f   :  { %143 = vpow2.f32 %v56_v8 }
  0x30   :  { %145 = vpow2.f32 %v58_v9 }
  0x39   :  { %v144_v10 = vpop.eup %143 }
  0x3a   :  { %v146_v11 = vpop.eup %145  ;;  %v60_v12 = vadd.f32 1.0, %v144_v10  ;;  %v63_v14 = vmul.f32 -0.5, %v144_v10  ;;  %v66_v17 = vand.u32 2147483647, %v144_v10 }
  0x3b   :  { %v69_v13 = vadd.f32 1.0, %v146_v11  ;;  %v72_v15 = vmul.f32 -0.5, %v146_v11  ;;  %v75_v19 = vand.u32 2147483647, %v146_v11 }
  0x3c   :  { %147 = vlog2.f32 %v60_v12  ;;  %v64_v16 = vadd.f32 1.0, %v63_v14  ;;  %vm67_vm0 = vcmp.lt.f32.partialorder %v66_v17, 0.0004427343 }
  0x3d   :  { %149 = vlog2.f32 %v69_v13  ;;  %v73_v18 = vadd.f32 1.0, %v72_v15  ;;  %vm76_vm1 = vcmp.lt.f32.partialorder %v75_v19, 0.0004427343 }
  0x3e   :  { %v65_v20 = vmul.f32 %v144_v10, %v64_v16 }
  0x3f   :  { %v74_v23 = vmul.f32 %v146_v11, %v73_v18 }
  0x46   :  { %v148_v21 = vpop.eup %147 }
  0x47   :  { %v150_v24 = vpop.eup %149  ;;  %v62_v25 = vmul.f32 0.6931472, %v148_v21 }
  0x48   :  { %v71_v27 = vmul.f32 0.6931472, %v150_v24 }
  0x49   :  { %v68_v28 = vsel %vm67_vm0, %v65_v20, %v62_v25 }
  0x4a   :  { %v78_v29 = vadd.f32 %v68_v28, %v46_v22  ;;  %v77_v30 = vsel %vm76_vm1, %v74_v23, %v71_v27 }
  0x4b   :  { %v79_v31 = vadd.f32 %v77_v30, %v47_v26 }
  0x4c   :  { %v80_v32 = vsel %vm48_vm2, %v44_v2, %v78_v29 }
  0x4d   :  { %v82_v33 = vsub.f32 0.0, %v80_v32  ;;  %v81_v34 = vsel %vm49_vm3, %v45_v3, %v79_v31 }
  0x4e   :  { %v83_v35 = vsub.f32 0.0, %v81_v34 }
  0x4f   :  { %v84_v36 = vsub.f32 %v82_v33, %v40_v0  ;;  %v86_v37 = vmul.f32 1.442695, %v82_v33 }
  0x50   :  { %v85_v38 = vsub.f32 %v83_v35, %v41_v1  ;;  %v88_v39 = vmul.f32 1.442695, %v83_v35 }
  0x51   :  { %151 = vpow2.f32 %v86_v37  ;;  %v90_v40 = vmul.f32 1.442695, %v84_v36 }
  0x52   :  { %153 = vpow2.f32 %v88_v39  ;;  %v92_v41 = vmul.f32 1.442695, %v85_v38 }
  0x53   :  { %155 = vpow2.f32 %v90_v40 }
  0x54   :  { %157 = vpow2.f32 %v92_v41 }
  0x5b   :  { %v152_v42 = vpop.eup %151 }
  0x5c   :  { %v154_v43 = vpop.eup %153  ;;  %v100_v45 = vmul.f32 %v152_v42, %v152_v42 }
  0x5d   :  { %v156_v46 = vpop.eup %155  ;;  %v101_v48 = vmul.f32 %v154_v43, %v154_v43 }
  0x5e   :  { %v158_v49 = vpop.eup %157  ;;  %v94_v50 = vmul.f32 %v156_v46, %v156_v46  ;;  %v102_v51 = vmul.f32 0.75, %v100_v45 }
  0x5f   :  { %v95_v52 = vmul.f32 %v158_v49, %v158_v49  ;;  %v103_v53 = vmul.f32 0.75, %v101_v48 }
  0x60   :  { %v96_v54 = vmul.f32 0.25, %v94_v50  ;;  %v104_v55 = vmul.f32 %v102_v51, %v84_v36 }
  0x61   :  { %v97_v56 = vmul.f32 0.25, %v95_v52  ;;  %v105_v57 = vmul.f32 %v103_v53, %v85_v38 }
  0x62   :  { %v98_v58 = vmul.f32 %v96_v54, %v82_v33  ;;  %v112_v59 = vsel %vm110_vm4, %v104_v55, 0.0 }
  0x63   :  { %v99_v60 = vmul.f32 %v97_v56, %v83_v35  ;;  %v113_v61 = vsel %vm111_vm5, %v105_v57, 0.0 }
  0x64   :  { %v108_v62 = vsel %vm106_vm6, %v98_v58, 0.0 }
  0x65   :  { %v114_v63 = vadd.f32 %v112_v59, %v108_v62  ;;  %v109_v0 = vsel %vm107_vm7, %v99_v60, 0.0 }
  0x66   :  { %v115_v1 = vadd.f32 %v113_v61, %v109_v0 }
  0x67   :  { %v116_v2 = vsub.f32 0.0, %v114_v63 }
  0x68   :  { %v117_v3 = vsub.f32 0.0, %v115_v1 }
  0x69   :  { %118 = vst [vmem:[#allocation7] sm:$0xff] %v116_v2 }
  0x6a   :  { %119 = vst [vmem:[#allocation7 + $0x8] sm:$0xff] %v117_v3 }
  0x6b   :  { %214 = shalt.err (!%p211_p6)
}
  0x6c   :  { %s215_s10 = scalar_lea.hbm %s298_s2, 256 }
  0x6d   :  { %p216_p7 = scmp.ne.s32.totalorder %s298_s2, %s215_s10  ;;  %p219_p8 = scmp.lt.u32.totalorder %s215_s10, %s298_s2 }
  0x6f   :  { %p221_p9 = pnand %p219_p8, %p216_p7 }
  0x71   :  { %224 = shalt.err (!%p221_p9)
}
  0x72   :  { %131 = dma.vmem_to_hbm [thread:$0]  %s126_s6, 256, %s298_s2, [#allocation4], %s232_s19, %s232_s19, %s233_s20  }
  0x73   :  { %229 = dma.done.wait [#allocation4], 256  }
  0x74   :  { %230 = vsyncadd [#allocation4], 4294967040 }
  0x75   :  { %135 = vsyncpa [#allocation3], 1 }
  0x76   :  { %136 = vsyncpa [#allocation6], 1 }
  0x77   :  { %137 = vsyncpa [#allocation4], 1 }

</bundles_post_ra>
